<compile_context>
chip_gen: v7x
topology: tpu7x:2x2x1
jax: 0.10.0
libtpu: 0.0.40
codegen_flags: <defaults>
</compile_context>

<pallas_src>
from functools import partial

import jax
import jax.numpy as jnp
from jax.experimental import pallas as pl
from jax.experimental.pallas import tpu as pltpu


# ----------------------------------------------------------------------------
# Fused inception kernel: one grid point = (batch element, row tile)
# ----------------------------------------------------------------------------
def _inception_kernel(xp_ref, w_ref, b_ref, o_ref, *, tile_h, out_w):
    # xp_ref: (1, H+2, W+2, Cin)  padded image for this batch element (bf16)
    # w_ref : (9*Cin, Cout)       fused weights (bf16)
    # b_ref : (1, Cout)           fused bias (f32)
    # o_ref : (1, tile_h*W, Cout) output rows for this row tile (f32)
    cin = xp_ref.shape[3]
    i = pl.program_id(1)
    r0 = pl.multiple_of(i * tile_h, tile_h)

    # Halo'd row strip (tile_h + 2 padded rows), read once from the
    # VMEM-resident block.
    strip = xp_ref[0, pl.ds(r0, tile_h + 2), :, :]        # (tile_h+2, W+2, Cin)

    # Build the 9 shifted taps in VMEM and fold (tap, Cin) into one
    # contraction dimension -> single MXU matmul instead of 9 tiny ones.
    taps = [strip[ky:ky + tile_h, kx:kx + out_w, :]
            for ky in range(3) for kx in range(3)]
    patches = jnp.concatenate(taps, axis=-1)              # (tile_h, W, 9*Cin)
    patches = patches.reshape(tile_h * out_w, 9 * cin)

    acc = jnp.dot(patches, w_ref[...], preferred_element_type=jnp.float32)
    acc = jnp.maximum(acc + b_ref[...], 0.0)              # bias + ReLU in f32
    o_ref[0] = acc.astype(o_ref.dtype)


def _fuse_inception_weights(params):
    """Pack conv1(1x1), conv2(1x1), conv3(3x3), conv4(3x3) into one
    (9*Cin, Cout) weight and (1, Cout) bias. Channel order matches
    torch.cat([x1, x2, x3, x4], dim=1)."""
    w1 = params["w1"][0, 0]                 # (Cin, br)
    w2 = params["w2"][0, 0]                 # (Cin, br)
    w3 = params["w3"]                       # (3, 3, Cin, br)
    w4 = params["w4"]                       # (3, 3, Cin, br)
    cin, br = w1.shape
    cout = 4 * br
    wf = jnp.zeros((3, 3, cin, cout), jnp.float32)
    wf = wf.at[1, 1, :, 0:br].set(w1)       # 1x1 branches -> centre tap only
    wf = wf.at[1, 1, :, br:2 * br].set(w2)
    wf = wf.at[:, :, :, 2 * br:3 * br].set(w3)
    wf = wf.at[:, :, :, 3 * br:].set(w4)
    wf = wf.reshape(9 * cin, cout)          # row order: (ky, kx, cin)
    bf = jnp.concatenate(
        [params["b1"], params["b2"], params["b3"], params["b4"]]
    ).reshape(1, cout)
    return wf, bf


def inception_module(x_nchw, params, *, tile_h=8):
    """InceptionModule forward. x_nchw: (N, Cin, H, W) as in the PyTorch
    module; returns (N, Cout, H, W)."""
    n, cin, h, w = x_nchw.shape
    wf, bf = _fuse_inception_weights(params)
    cout = wf.shape[1]

    th = max(1, min(tile_h, h))
    while h % th:                           # pick a row-tile that divides H
        th -= 1

    # Layout glue: NCHW -> NHWC, zero-pad H/W by 1 (SAME for the 3x3 branches),
    # bf16 for the MXU inputs (f32 accumulate inside the kernel).
    xh = jnp.transpose(x_nchw, (0, 2, 3, 1)).astype(jnp.bfloat16)
    xp = jnp.pad(xh, ((0, 0), (1, 1), (1, 1), (0, 0)))
    wf16 = wf.astype(jnp.bfloat16)

    flops = 2 * n * h * w * (9 * cin) * cout
    bytes_accessed = (xp.size * 2 + wf16.size * 2 + bf.size * 4
                      + n * h * w * cout * 4)

    out = pl.pallas_call(
        partial(_inception_kernel, tile_h=th, out_w=w),
        out_shape=jax.ShapeDtypeStruct((n, h * w, cout), x_nchw.dtype),
        grid=(n, h // th),
        in_specs=[
            # Full padded image per batch element; block index ignores the
            # row-tile axis so it stays VMEM resident across row tiles.
            pl.BlockSpec((1, h + 2, w + 2, cin), lambda b, i: (b, 0, 0, 0)),
            pl.BlockSpec((9 * cin, cout), lambda b, i: (0, 0)),
            pl.BlockSpec((1, cout), lambda b, i: (0, 0)),
        ],
        out_specs=pl.BlockSpec((1, th * w, cout), lambda b, i: (b, i, 0)),
        compiler_params=pltpu.CompilerParams(
            dimension_semantics=("parallel", "parallel")),
        cost_estimate=pl.CostEstimate(
            flops=flops, transcendentals=0, bytes_accessed=bytes_accessed),
    )(xp, wf16, bf)

    out = out.reshape(n, h, w, cout)
    return jnp.transpose(out, (0, 3, 1, 2))


# ----------------------------------------------------------------------------
# Pure-JAX f32 reference for a sanity check
# ----------------------------------------------------------------------------
def _reference(x_nchw, params):
    dn = ("NHWC", "HWIO", "NHWC")
    x = jnp.transpose(x_nchw, (0, 2, 3, 1))

    def conv(xin, wgt, bias, pad):
        y = jax.lax.conv_general_dilated(
            xin, wgt, (1, 1), pad, dimension_numbers=dn)
        return jax.nn.relu(y + bias)

    y1 = conv(x, params["w1"], params["b1"], "VALID")
    y2 = conv(x, params["w2"], params["b2"], "VALID")
    y3 = conv(x, params["w3"], params["b3"], "SAME")
    y4 = conv(x, params["w4"], params["b4"], "SAME")
    y = jnp.concatenate([y1, y2, y3, y4], axis=-1)
    return jnp.transpose(y, (0, 3, 1, 2))


def _init_params(key, cin, cout):
    br = cout // 4
    ks = jax.random.split(key, 8)

    def conv_w(k, kh, kw, ci, co):
        std = (2.0 / (kh * kw * ci)) ** 0.5
        return jax.random.normal(k, (kh, kw, ci, co), jnp.float32) * std

    return {
        "w1": conv_w(ks[0], 1, 1, cin, br),
        "b1": jax.random.normal(ks[1], (br,), jnp.float32) * 0.01,
        "w2": conv_w(ks[2], 1, 1, cin, br),
        "b2": jax.random.normal(ks[3], (br,), jnp.float32) * 0.01,
        "w3": conv_w(ks[4], 3, 3, cin, br),
        "b3": jax.random.normal(ks[5], (br,), jnp.float32) * 0.01,
        "w4": conv_w(ks[6], 3, 3, cin, br),
        "b4": jax.random.normal(ks[7], (br,), jnp.float32) * 0.01,
    }


if __name__ == "__main__":
    N, CIN, H, W = 2, 4, 16, 16     # matches torch input (2, 4, 16, 16) NCHW
    COUT = 32

    key = jax.random.PRNGKey(0)
    kx, kp = jax.random.split(key)
    x = jax.random.normal(kx, (N, CIN, H, W), jnp.float32)
    params = _init_params(kp, CIN, COUT)

    fwd = jax.jit(inception_module)
    out = fwd(x, params)
    jax.block_until_ready(out)

    assert out.shape == (N, COUT, H, W), out.shape
    assert bool(jnp.all(jnp.isfinite(out)))

    ref = _reference(x, params)
    # bf16 MXU inputs vs f32 reference -> modest tolerance.
    assert bool(jnp.allclose(out, ref, atol=5e-2, rtol=5e-2)), float(
        jnp.max(jnp.abs(out - ref)))

    print("KERNEL_OK")
</pallas_src>

<mosaic_0001>
module attributes {stable_mosaic.version = 11 : i64} {
  func.func @_inception_kernel(%arg0: i32, %arg1: i32, %arg2: memref<1x18x18x4xbf16, #tpu.memory_space<vmem>>, %arg3: memref<36x32xbf16, #tpu.memory_space<vmem>>, %arg4: memref<1x32xf32, #tpu.memory_space<vmem>>, %arg5: memref<1x128x32xf32, #tpu.memory_space<vmem>>) attributes {dimension_semantics = [#tpu.dimension_semantics<parallel>, #tpu.dimension_semantics<parallel>], iteration_bounds = array<i64: 2, 2>, scalar_prefetch = 0 : i64, scratch_operands = 0 : i64, tpu.core_type = #tpu.core_type<tc>, window_params = [{transform_indices = @transform_0, window_bounds = array<i64: 1, 18, 18, 4>}, {pipeline_mode = #tpu.pipeline_mode<synchronous>, transform_indices = @transform_1, window_bounds = array<i64: 36, 32>}, {pipeline_mode = #tpu.pipeline_mode<synchronous>, transform_indices = @transform_2, window_bounds = array<i64: 1, 32>}, {transform_indices = @transform_3, window_bounds = array<i64: 1, 128, 32>}]} {
    %c8_i32 = arith.constant 8 : i32
    %0 = arith.muli %arg1, %c8_i32 : i32
    %1 = tpu.assume_multiple %0, 8 : i32
    %c0 = arith.constant 0 : index
    %2 = arith.index_cast %1 : i32 to index
    %c0_0 = arith.constant 0 : index
    %c0_1 = arith.constant 0 : index
    %3 = vector.load %arg2[%c0, %2, %c0_0, %c0_1] : memref<1x18x18x4xbf16, #tpu.memory_space<vmem>>, vector<1x10x18x4xbf16>
    %4 = vector.shape_cast %3 : vector<1x10x18x4xbf16> to vector<10x18x4xbf16>
    %5 = vector.extract_strided_slice %4 {offsets = [0, 0, 0], sizes = [8, 16, 4], strides = [1, 1, 1]} : vector<10x18x4xbf16> to vector<8x16x4xbf16>
    %6 = vector.extract_strided_slice %4 {offsets = [0, 1, 0], sizes = [8, 16, 4], strides = [1, 1, 1]} : vector<10x18x4xbf16> to vector<8x16x4xbf16>
    %7 = vector.extract_strided_slice %4 {offsets = [0, 2, 0], sizes = [8, 16, 4], strides = [1, 1, 1]} : vector<10x18x4xbf16> to vector<8x16x4xbf16>
    %8 = vector.extract_strided_slice %4 {offsets = [1, 0, 0], sizes = [8, 16, 4], strides = [1, 1, 1]} : vector<10x18x4xbf16> to vector<8x16x4xbf16>
    %9 = vector.extract_strided_slice %4 {offsets = [1, 1, 0], sizes = [8, 16, 4], strides = [1, 1, 1]} : vector<10x18x4xbf16> to vector<8x16x4xbf16>
    %10 = vector.extract_strided_slice %4 {offsets = [1, 2, 0], sizes = [8, 16, 4], strides = [1, 1, 1]} : vector<10x18x4xbf16> to vector<8x16x4xbf16>
    %11 = vector.extract_strided_slice %4 {offsets = [2, 0, 0], sizes = [8, 16, 4], strides = [1, 1, 1]} : vector<10x18x4xbf16> to vector<8x16x4xbf16>
    %12 = vector.extract_strided_slice %4 {offsets = [2, 1, 0], sizes = [8, 16, 4], strides = [1, 1, 1]} : vector<10x18x4xbf16> to vector<8x16x4xbf16>
    %13 = vector.extract_strided_slice %4 {offsets = [2, 2, 0], sizes = [8, 16, 4], strides = [1, 1, 1]} : vector<10x18x4xbf16> to vector<8x16x4xbf16>
    %14 = tpu.concatenate %5, %6, %7, %8, %9, %10, %11, %12, %13 in 2 : vector<8x16x4xbf16>, vector<8x16x4xbf16>, vector<8x16x4xbf16>, vector<8x16x4xbf16>, vector<8x16x4xbf16>, vector<8x16x4xbf16>, vector<8x16x4xbf16>, vector<8x16x4xbf16>, vector<8x16x4xbf16> -> vector<8x16x36xbf16>
    %15 = vector.shape_cast %14 : vector<8x16x36xbf16> to vector<128x36xbf16>
    %c0_2 = arith.constant 0 : index
    %c0_3 = arith.constant 0 : index
    %16 = vector.load %arg3[%c0_2, %c0_3] : memref<36x32xbf16, #tpu.memory_space<vmem>>, vector<36x32xbf16>
    %cst = arith.constant dense<0.000000e+00> : vector<128x32xf32>
    %17 = tpu.matmul %15, %16, %cst {dimension_numbers = #tpu.dot_dimension_numbers<[1], [0], [0], [1], [0, 0, 1, 1], [], []>} : vector<128x36xbf16>, vector<36x32xbf16>, vector<128x32xf32> -> vector<128x32xf32>
    %c0_4 = arith.constant 0 : index
    %c0_5 = arith.constant 0 : index
    %18 = vector.load %arg4[%c0_4, %c0_5] : memref<1x32xf32, #tpu.memory_space<vmem>>, vector<1x32xf32>
    %19 = vector.broadcast %18 : vector<1x32xf32> to vector<128x32xf32>
    %20 = arith.addf %17, %19 : vector<128x32xf32>
    %cst_6 = arith.constant 0.000000e+00 : f32
    %21 = vector.broadcast %cst_6 : f32 to vector<128x32xf32>
    %22 = arith.maximumf %20, %21 : vector<128x32xf32>
    %c0_7 = arith.constant 0 : index
    %c0_8 = arith.constant 0 : index
    %c0_9 = arith.constant 0 : index
    %23 = vector.load %arg5[%c0_7, %c0_8, %c0_9] : memref<1x128x32xf32, #tpu.memory_space<vmem>>, vector<1x128x32xf32>
    %24 = vector.shape_cast %23 : vector<1x128x32xf32> to vector<128x32xf32>
    %25 = vector.shape_cast %22 : vector<128x32xf32> to vector<1x128x32xf32>
    tpu.vector_store %arg5[%c0_7, %c0_8, %c0_9], %25 {strides = array<i32>} : memref<1x128x32xf32, #tpu.memory_space<vmem>>, vector<1x128x32xf32>,
    return
  }
  func.func @transform_0(%arg0: i32, %arg1: i32) -> (i32, i32, i32, i32) {
    %c0_i32 = arith.constant 0 : i32
    %c0_i32_0 = arith.constant 0 : i32
    %c0_i32_1 = arith.constant 0 : i32
    %c0_i32_2 = arith.constant 0 : i32
    return %arg0, %c0_i32, %c0_i32_0, %c0_i32_1 : i32, i32, i32, i32
  }
  func.func @transform_1(%arg0: i32, %arg1: i32) -> (i32, i32) {
    %c0_i32 = arith.constant 0 : i32
    %c0_i32_0 = arith.constant 0 : i32
    %c0_i32_1 = arith.constant 0 : i32
    return %c0_i32, %c0_i32_0 : i32, i32
  }
  func.func @transform_2(%arg0: i32, %arg1: i32) -> (i32, i32) {
    %c0_i32 = arith.constant 0 : i32
    %c0_i32_0 = arith.constant 0 : i32
    %c0_i32_1 = arith.constant 0 : i32
    return %c0_i32, %c0_i32_0 : i32, i32
  }
  func.func @transform_3(%arg0: i32, %arg1: i32) -> (i32, i32, i32) {
    %c0_i32 = arith.constant 0 : i32
    %c0_i32_0 = arith.constant 0 : i32
    return %arg0, %arg1, %c0_i32 : i32, i32, i32
  }
}

</mosaic_0001>

<bundles_post_ra>
// kernel: inception_module.1
= control target key start
LH: loop header
LB: loop body
LE: loop exit
PB: predicated region body
PF: predicated region fallthrough
CT: control target
= control target key end

     0   :  { %8 = vsyncpa [#allocation3], 0  ;;  %s1802_s0 = inlined_call_operand.vmem [shape: bf16[2,18,18,4], index: 0, kind: input, shape index: {}]   ;;  %s1803_s1 = inlined_call_operand.vmem [shape: bf16[36,32], index: 1, kind: input, shape index: {}]   ;;  %s1804_s2 = inlined_call_operand.vmem [shape: f32[1,32], index: 2, kind: input, shape index: {}]   ;;  %s1805_s3 = inlined_call_operand.hbm [shape: f32[2,256,32], index: 3, kind: output, shape index: {}]  }
   0x1   :  { %10 = vsyncpa [#allocation3 + $0x1], 0  ;;  %s1306_s12 = smov 0   ;;  %s1308_s13 = smov 0  }
   0x2   :  { %s1310_s14 = smov 0   ;;  %s1312_s15 = smov 0  }
   0x3   :  { %s1314_s16 = smov 0   ;;  %s1316_s17 = smov 0  }
   0x4   :  { %s1318_s18 = smov 0   ;;  %s1320_s19 = smov 0  }
   0x5 LB: > { %s986_s20 = sadd.s32 4294967295, %s1274_s19   ;;  %s987_s21 = sadd.s32 4294967294, %s1274_s19   ;;  %s1274_s19 = sphi %s1320_s19, %s16_s19   ;;  %s1270_s18 = sphi %s1318_s18, %s1814_s18   ;;  %s1266_s17 = sphi %s1316_s17, %s1813_s17   ;;  %s1262_s16 = sphi %s1314_s16, %s1812_s16   ;;  %s1258_s15 = sphi %s1312_s15, %s1811_s15   ;;  %s1254_s14 = sphi %s1310_s14, %s1810_s14   ;;  %s1250_s13 = sphi %s1308_s13, %s1809_s13   ;;  %s1246_s12 = sphi %s1306_s12, %s1808_s12  }
   0x6   : > { %s25_s22 = sadd.s32 1, %s1266_s17  ;;  %s28_s23 = sadd.s32 1, %s1270_s18 }
   0x7   : > { %p26_p0 = scmp.ge.s32.totalorder %s25_s22, 2  ;;  %p115_p1 = scmp.ne.s32.totalorder %s1254_s14, %s1250_s13 }
   0x8   : > { %p116_p2 = scmp.eq.s32.totalorder %s986_s20, 3  ;;  %p121_p5 = scmp.ne.s32.totalorder %s1250_s13, %s1246_s12 }
   0x9   : > { %s1816_s22 = smov (%p26_p0, %s25_s22), 0  ;;  %s1818_s23 = smov (!%p26_p0, %s28_s23), %s1270_s18 }
   0xa   : > { %s101_s24 = ssub.s32 %s1266_s17, %s1816_s22  ;;  %p1357_p3 = por %p116_p2, %p115_p1 }
   0xb   : > { %p30_p4 = scmp.ge.s32.totalorder %s1818_s23, 2  ;;  %p122_p6 = scmp.eq.s32.totalorder %s987_s21, 3 }
   0xc   : > { %p990_p7 = scmp.ge.s32.totalorder %s1274_s19, 1  ;;  %p154_p9 = scmp.lt.s32.totalorder %s1274_s19, 5 }
   0xd   : > { %s1820_s23 = smov (%p30_p4, %s1818_s23), 0  ;;  %p1366_p8 = por %p122_p6, %p121_p5 }
   0xe   : > { %s100_s27 = ssub.s32 %s1270_s18, %s1820_s23  ;;  %s105_s28 = sadd.s32 1, %s1254_s14 }
   0xf   : > { %s102_s29 = sor.u32 %s101_s24, %s100_s27  ;;  %p155_p10 = pnand %p990_p7, %p154_p9 }
  0x10   : > { %p103_p11 = scmp.eq.s32.totalorder %s102_s29, 0  ;;  %p178_p12 = scmp.lt.s32.totalorder (!%p155_p10), %s1262_s16, 1  ;;  %vm396_vm0 = vcmask (!%p155_p10), 1046528   ;;  %vm283_vm1 = vsmask.f32 (!%p155_p10), 7424  ;;  %vm759_vm2 = vcmask (!%p155_p10), 1041408  }
  0x11   : > { %158 = sbr.rel (%p155_p10) target bundleno = 506 (0x1fa), region = 32  ;;  %s1276_s11 = smov (!%p155_p10), 12   ;;  %vm579_vm3 = vcmask (!%p155_p10), 31744   ;;  %vm596_vm4 = vcmask (!%p155_p10), 64512   ;;  %vm630_vm5 = vcmask (!%p155_p10), 130048   ;;  %vm613_vm6 = vcmask (!%p155_p10), 97280  }
  0x12   : > { %s1375_s30 = scalar_select %p103_p11, %s1254_s14, %s105_s28  }
  0x13   : > { %s1034_s5 = smul.u32 (!%p155_p10), 96, %s1258_s15  ;;  %s1277_s20 = smov (!%p155_p10), 8   ;;  %vm647_vm7 = vcmask (!%p155_p10), 162816   ;;  %vm664_vm8 = vcmask (!%p155_p10), 195584   ;;  %vm681_vm9 = vcmask (!%p155_p10), 228352   ;;  %vm698_vm10 = vcmask (!%p155_p10), 261120  }
  0x14   : > { %s1278_s21 = smov (!%p155_p10), 4   ;;  %s1279_s24 = smov (!%p155_p10), 16   ;;  %vm742_vm11 = vcmask (!%p155_p10), 293888  }
  0x15   : > { %s1280_s27 = smov (!%p155_p10), 20   ;;  %s1281_s28 = smov (!%p155_p10), 24  }
  0x16   : > { %s1282_s7 = smov (!%p155_p10), 28   ;;  %s1029_s29 = sshll.u32 (!%p155_p10), %s1258_s15, 4 }
  0x18   : > { %s179_s4 = scalar_select %p178_p12, %s1262_s16, 1 }
  0x1a   : > { %s1076_s6 = smul.u32 216, %s179_s4  ;;  %s1030_s4 = sshll.u32 %s1262_s16, 5 }
  0x1c   : > { %s182_s9 = scalar_lea.vmem %s1802_s0, %s1076_s6 }
  0x1d   : > { %s1383_s10 = scalar_lea.vmem %s182_s9, %s1034_s5  ;;  %s905_s5 = sadd.s32 %s1030_s4, %s1029_s29 }
  0x1e   : > { %v1386_v0 = vld [vmem:[%s1383_s10 + $0x3c] sm:$0xff]   ;;  %v1389_v1 = vld [vmem:[%s1383_s10 + $0xc] sm:$0xff]   ;;  %v1160_v3 = vld [vmem:[%s1383_s10 + $0x38] ss:$0 sps:$4 sm:$0x11]   ;;  %s1031_s15 = sshll.u32 %s905_s5, 7 }
  0x1f   : > { %450 = vrot.lane.b32.xlu1 %v1386_v0, %s1276_s11  ;;  %442 = vrot.lane.b32.xlu0 %v1389_v1, %s1276_s11  ;;  %v1396_v2 = vld [vmem:[%s1383_s10 + $0x30] sm:$0xff]   ;;  %v1400_v4 = vld [vmem:[%s1383_s10] sm:$0xff]   ;;  %v412_v5 = vrot.slane %v1386_v0, 1  ;;  %v410_v7 = vrot.slane %v1160_v3, 1  ;;  %v400_v9 = vrot.slane %v1389_v1, 1  ;;  %v297_v16 = vshrl.u32 %v1389_v1, 16  ;;  %s1735_s8 = scalar_lea.hbm %s1805_s3, %s1031_s15 }
  0x20   : > { %v409_v6 = vrot.slane %v1396_v2, 1  ;;  %v1162_v8 = vld [vmem:[%s1383_s10 + $0x8] ss:$0 sps:$4 sm:$0x11]   ;;  %v397_v10 = vrot.slane %v1400_v4, 1  ;;  %v299_v17 = vshll.u32 %v1389_v1, 16 }
  0x21   : > { %v1163_v11 = vld [vmem:[%s1383_s10 + $0x44] ss:$0 sps:$4 sm:$0x11]   ;;  %v398_v13 = vrot.slane %v1162_v8, 1  ;;  %v285_v18 = vshrl.u32 %v1400_v4, 16  ;;  %v287_v22 = vshll.u32 %v1400_v4, 16 }
  0x22   : > { %v1409_v12 = vsel %vm396_vm0, %v409_v6, %v410_v7  ;;  %v1164_v14 = vld [vmem:[%s1383_s10 + $0x14] ss:$0 sps:$4 sm:$0x11]   ;;  %v413_v15 = vrot.slane %v1163_v11, 1  ;;  %v301_v24 = vrot.slane %v299_v17, 1  ;;  %v292_v25 = vshll.u32 %v1162_v8, 16 }
  0x23   : > { %429 = vrot.lane.b32.xlu1 %v1409_v12, %s1277_s20  ;;  %v399_v19 = vsel %vm396_vm0, %v397_v10, %v398_v13  ;;  %v401_v20 = vrot.slane %v1164_v14, 1  ;;  %v304_v21 = vshll.u32 %v1164_v14, 16  ;;  %v345_v26 = vshrl.u32 %v1386_v0, 16  ;;  %v1433_v39 = vld [vmem:[%s1383_s10 + $0x48] sm:$0xff]   ;;  %v1440_v46 = vld [vmem:[%s1383_s10 + $0x18] sm:$0xff]   ;;  %v1458_v57 = vld [vmem:[%s1383_s10 + $0x60] sm:$0xff]  }
  0x24   : > { %421 = vrot.lane.b32.xlu0 %v399_v19, %s1277_s20  ;;  %v1421_v23 = vsel %vm396_vm0, %v412_v5, %v413_v15  ;;  %v289_v29 = vrot.slane %v287_v22, 1  ;;  %v347_v30 = vshll.u32 %v1386_v0, 16  ;;  %v302_v31 = vor.u32 %v301_v24, %v297_v16  ;;  %v1167_v47 = vld [vmem:[%s1383_s10 + $0x50] ss:$0 sps:$4 sm:$0x11]  }
  0x25   : > { %v1425_v27 = vsel %vm396_vm0, %v400_v9, %v401_v20  ;;  %v306_v28 = vrot.slane %v304_v21, 1  ;;  %v294_v32 = vrot.slane %v292_v25, 1  ;;  %v352_v33 = vshll.u32 %v1163_v11, 16  ;;  %v1168_v51 = vld [vmem:[%s1383_s10 + $0x20] ss:$0 sps:$4 sm:$0x11]  }
  0x26   : > { %v333_v34 = vshrl.u32 %v1396_v2, 16  ;;  %v290_v35 = vor.u32 %v289_v29, %v285_v18  ;;  %v349_v36 = vrot.slane %v347_v30, 1  ;;  %v335_v37 = vshll.u32 %v1396_v2, 16  ;;  %v1466_v61 = vld [vmem:[%s1383_s10 + $0x6c] sm:$0xff]  }
  0x27   : > { %431 = vrot.lane.b32.xlu1 %v1421_v23, %s1277_s20  ;;  %v340_v38 = vshll.u32 %v1160_v3, 16  ;;  %v307_v40 = vsel %vm283_vm1, %v302_v31, %v306_v28  ;;  %v354_v41 = vrot.slane %v352_v33, 1  ;;  %v359_v50 = vshll.u32 %v1433_v39, 16  ;;  %v1174_v3 = vld [vmem:[%s1383_s10 + $0x68] ss:$0 sps:$4 sm:$0x11]  }
  0x28   : > { %423 = vrot.lane.b32.xlu0 %v1425_v27, %s1277_s20  ;;  %v295_v42 = vsel %vm283_vm1, %v290_v35, %v294_v32  ;;  %v350_v43 = vor.u32 %v349_v36, %v345_v26  ;;  %v337_v44 = vrot.slane %v335_v37, 1  ;;  %v311_v53 = vshll.u32 %v1440_v46, 16  ;;  %v1176_v15 = vld [vmem:[%s1383_s10 + $0x74] ss:$0 sps:$4 sm:$0x11]  }
  0x29   : > { %v342_v45 = vrot.slane %v340_v38, 1  ;;  %v357_v54 = vshrl.u32 %v1433_v39, 16  ;;  %v361_v55 = vrot.slane %v359_v50, 1  ;;  %v364_v56 = vshll.u32 %v1167_v47, 16  ;;  %v1511_v38 = vld [vmem:[%s1383_s10 + $0x54] sm:$0xff]  }
  0x2a   : > { %v1445_v48 = vsel %vm283_vm1, %v350_v43, %v354_v41  ;;  %v338_v49 = vor.u32 %v337_v44, %v333_v34  ;;  %v316_v58 = vshll.u32 %v1168_v51, 16  ;;  %v309_v59 = vshrl.u32 %v1440_v46, 16  ;;  %v1517_v41 = vld [vmem:[%s1383_s10 + $0x24] sm:$0xff]   ;;  %v1172_v44 = vld [vmem:[%s1383_s10 + $0x2c] ss:$0 sps:$4 sm:$0x11]  }
  0x2b   : > { %382 = vrot.lane.b32.xlu1 %v307_v40, %s1278_s21  ;;  %v313_v60 = vrot.slane %v311_v53, 1  ;;  %v362_v62 = vor.u32 %v361_v55, %v357_v54  ;;  %v366_v63 = vrot.slane %v364_v56, 1  ;;  %v462_v5 = vshrl.u32 %v1458_v57, 16  ;;  %v1178_v55 = vld [vmem:[%s1803_s1 + $0x8] sm:$0xff]  }
  0x2c   : > { %380 = vrot.lane.b32.xlu0 %v295_v42, %s1278_s21  ;;  %v1451_v52 = vsel %vm283_vm1, %v338_v49, %v342_v45  ;;  %v464_v6 = vshll.u32 %v1458_v57, 16  ;;  %v318_v7 = vrot.slane %v316_v58, 1  ;;  %v489_v8 = vrot.slane %v1458_v57, 1  ;;  %v1171_v42 = vld [vmem:[%s1383_s10 + $0x5c] ss:$0 sps:$4 sm:$0x11]  }
  0x2d   : > { %v314_v9 = vor.u32 %v313_v60, %v309_v59  ;;  %v469_v11 = vshll.u32 %v1174_v3, 16  ;;  %v533_v13 = vshrl.u32 %v1466_v61, 16  ;;  %v490_v14 = vrot.slane %v1174_v3, 1  ;;  %s1283_s10 = smov 32  }
  0x2e   : > { %v466_v10 = vrot.slane %v464_v6, 1  ;;  %v535_v16 = vshll.u32 %v1466_v61, 16  ;;  %v560_v17 = vrot.slane %v1466_v61, 1  ;;  %v1481_v18 = vsel %vm283_vm1, %v362_v62, %v366_v63  ;;  %v1179_v62 = vld [vmem:[%s1803_s1 + $0x10] ss:$0 sps:$4 sm:$0x33]  }
  0x2f   : > { %390 = vrot.lane.b32.xlu1 %v1445_v48, %s1278_s21  ;;  %v471_v20 = vrot.slane %v469_v11, 1  ;;  %v1485_v21 = vsel %vm396_vm0, %v489_v8, %v490_v14  ;;  %v540_v24 = vshll.u32 %v1176_v15, 16  ;;  %v561_v25 = vrot.slane %v1176_v15, 1 }
  0x30   : > { %388 = vrot.lane.b32.xlu0 %v1451_v52, %s1278_s21  ;;  %v467_v19 = vor.u32 %v466_v10, %v462_v5  ;;  %v537_v22 = vrot.slane %v535_v16, 1  ;;  %v1488_v26 = vsel %vm283_vm1, %v314_v9, %v318_v7  ;;  %v415_v32 = vrot.slane %v1433_v39, 1 }
  0x31   : > { %v542_v30 = vrot.slane %v540_v24, 1  ;;  %v1496_v31 = vsel %vm396_vm0, %v560_v17, %v561_v25  ;;  %v416_v33 = vrot.slane %v1167_v47, 1  ;;  %v403_v35 = vrot.slane %v1440_v46, 1 }
  0x32   : > { %v1491_v28 = vsel %vm283_vm1, %v467_v19, %v471_v20  ;;  %v538_v29 = vor.u32 %v537_v22, %v533_v13  ;;  %v404_v36 = vrot.slane %v1168_v51, 1  ;;  %v371_v43 = vshll.u32 %v1511_v38, 16 }
  0x33   : > { %452 = vrot.lane.b32.xlu1 %v1433_v39, %s1276_s11  ;;  %v1508_v37 = vsel %vm396_vm0, %v415_v32, %v416_v33  ;;  %v323_v45 = vshll.u32 %v1517_v41, 16  ;;  %v369_v47 = vshrl.u32 %v1511_v38, 16  ;;  %v376_v50 = vshll.u32 %v1171_v42, 16 }
  0x34   : > { %444 = vrot.lane.b32.xlu0 %v1440_v46, %s1276_s11  ;;  %v1502_v34 = vsel %vm283_vm1, %v538_v29, %v542_v30  ;;  %v373_v49 = vrot.slane %v371_v43, 1  ;;  %v321_v51 = vshrl.u32 %v1517_v41, 16  ;;  %v328_v54 = vshll.u32 %v1172_v44, 16 }
  0x35   : > { %v325_v53 = vrot.slane %v323_v45, 1  ;;  %v378_v58 = vrot.slane %v376_v50, 1  ;;  %v761_v3 = vsel %vm759_vm2, %v1179_v62, 0  ;;  %v418_v6 = vrot.slane %v1511_v38, 1 }
  0x36   : > { %v374_v56 = vor.u32 %v373_v49, %v369_v47  ;;  %v330_v60 = vrot.slane %v328_v54, 1  ;;  %v419_v7 = vrot.slane %v1171_v42, 1  ;;  %v406_v8 = vrot.slane %v1517_v41, 1 }
  0x37   : > { %481 = vrot.lane.b32.xlu1 %v1445_v48, %s1279_s24  ;;  %v326_v59 = vor.u32 %v325_v53, %v321_v51  ;;  %v407_v9 = vrot.slane %v1172_v44, 1 }
  0x38   : > { %473 = vrot.lane.b32.xlu0 %v307_v40, %s1279_s24  ;;  %v405_v40 = vsel %vm396_vm0, %v403_v35, %v404_v36  ;;  %v379_v63 = vsel %vm283_vm1, %v374_v56, %v378_v58  ;;  %v420_v10 = vsel %vm396_vm0, %v418_v6, %v419_v7 }
  0x39   : > { %v331_v5 = vsel %vm283_vm1, %v326_v59, %v330_v60  ;;  %v408_v11 = vsel %vm396_vm0, %v406_v8, %v407_v9 }
  0x3b   : > { %483 = vrot.lane.b32.xlu1 %v1481_v18, %s1279_s24 }
  0x3c   : > { %475 = vrot.lane.b32.xlu0 %v1488_v26, %s1279_s24 }
  0x3f   : > { %500 = vrot.lane.b32.xlu1 %v1421_v23, %s1280_s27 }
  0x40   : > { %492 = vrot.lane.b32.xlu0 %v1425_v27, %s1280_s27  ;;  %v1177_v27 = vld [vmem:[%s1803_s1] sm:$0xff]  }
  0x41   : > { %1046 = vmatprep.subr.bf16.mxu0 %v1177_v27  ;;  %1068 = vmatprep.subr.bf16.mxu1 %v1177_v27 }
  0x42   : > { %1047 = vmatpush3.bf16.msra.mxu0 %v1177_v27  ;;  %1071 = vmatpush3.bf16.msra.mxu1 %v1177_v27 }
  0x43   : > { %502 = vrot.lane.b32.xlu1 %v1508_v37, %s1280_s27  ;;  %1048 = vmatprep.subr.bf16.mxu0 %v1178_v55 }
  0x44   : > { %494 = vrot.lane.b32.xlu0 %v405_v40, %s1280_s27  ;;  %1069 = vmatprep.subr.bf16.mxu1 %v1178_v55 }
  0x46   : > { %1049 = vmatpush3.bf16.msra.mxu0 %v1178_v55  ;;  %1072 = vmatpush3.bf16.msra.mxu1 %v1178_v55 }
  0x47   : > { %521 = vrot.lane.b32.xlu1 %v1433_v39, %s1281_s28  ;;  %1074 = vmatprep.subr.msk.bf16.mxu0 %vm759_vm2, %v1179_v62 }
  0x48   : > { %513 = vrot.lane.b32.xlu0 %v1440_v46, %s1281_s28  ;;  %1075 = vmatprep.subr.msk.bf16.mxu1 %vm759_vm2, %v1179_v62 }
  0x4a   : > { %1051 = vmatpush3.bf16.msra.mxu0 %v761_v3  ;;  %1073 = vmatpush3.bf16.msra.mxu1 %v761_v3 }
  0x4b   : > { %523 = vrot.lane.b32.xlu1 %v1511_v38, %s1281_s28 }
  0x4c   : > { %515 = vrot.lane.b32.xlu0 %v1517_v41, %s1281_s28 }
  0x4f   : > { %552 = vrot.lane.b32.xlu1 %v1481_v18, %s1282_s7 }
  0x50   : > { %544 = vrot.lane.b32.xlu0 %v1488_v26, %s1282_s7 }
  0x53   : > { %554 = vrot.lane.b32.xlu1 %v379_v63, %s1282_s7 }
  0x54   : > { %546 = vrot.lane.b32.xlu0 %v331_v5, %s1282_s7 }
  0x57   : > { %571 = vrot.lane.b32.xlu1 %v1508_v37, %s1283_s10 }
  0x58   : > { %563 = vrot.lane.b32.xlu0 %v405_v40, %s1283_s10 }
  0x5b   : > { %392 = vrot.lane.b32.xlu1 %v1481_v18, %s1278_s21 }
  0x5c   : > { %384 = vrot.lane.b32.xlu0 %v1488_v26, %s1278_s21 }
  0x5f   : > { %573 = vrot.lane.b32.xlu1 %v420_v10, %s1283_s10 }
  0x60   : > { %565 = vrot.lane.b32.xlu0 %v408_v11, %s1283_s10 }
  0x63   : > { %394 = vrot.lane.b32.xlu1 %v379_v63, %s1278_s21 }
  0x64   : > { %386 = vrot.lane.b32.xlu0 %v331_v5, %s1278_s21  ;;  %s1284_s21 = smov [#allocation2]  }
  0x67   : > { %433 = vrot.lane.b32.xlu1 %v1508_v37, %s1277_s20 }
  0x68   : > { %425 = vrot.lane.b32.xlu0 %v405_v40, %s1277_s20 }
  0x6b   : > { %435 = vrot.lane.b32.xlu1 %v420_v10, %s1277_s20 }
  0x6c   : > { %427 = vrot.lane.b32.xlu0 %v408_v11, %s1277_s20 }
  0x6f   : > { %454 = vrot.lane.b32.xlu1 %v1511_v38, %s1276_s11 }
  0x70   : > { %446 = vrot.lane.b32.xlu0 %v1517_v41, %s1276_s11 }
  0x73   : > { %456 = vrot.lane.b32.xlu1 %v1458_v57, %s1276_s11 }
  0x74   : > { %448 = vrot.lane.b32.xlu0 %v1396_v2, %s1276_s11  ;;  %s175_s11 = sand.u32 1, %s1250_s13  }
  0x75   : > { %s1749_s9 = scalar_lea.sflag [#allocation3], %s175_s11 }
  0x77   : > { %485 = vrot.lane.b32.xlu1 %v379_v63, %s1279_s24 }
  0x78   : > { %477 = vrot.lane.b32.xlu0 %v331_v5, %s1279_s24 }
  0x7b   : > { %487 = vrot.lane.b32.xlu1 %v1491_v28, %s1279_s24 }
  0x7c   : > { %479 = vrot.lane.b32.xlu0 %v1451_v52, %s1279_s24  ;;  %s1184_s24 = sshll.u32 %s1284_s21, 4  ;;  %s1185_s24 = int_to_ptr.vmem [resolvable:$false] %s1184_s24 }
  0x7f   : > { %504 = vrot.lane.b32.xlu1 %v420_v10, %s1280_s27 }
  0x80   : > { %496 = vrot.lane.b32.xlu0 %v408_v11, %s1280_s27 }
  0x83   : > { %506 = vrot.lane.b32.xlu1 %v1485_v21, %s1280_s27 }
  0x84   : > { %498 = vrot.lane.b32.xlu0 %v1409_v12, %s1280_s27  ;;  %s991_s27 = sshll.u32 %s175_s11, 7 }
  0x87   : > { %525 = vrot.lane.b32.xlu1 %v1458_v57, %s1281_s28 }
  0x88   : > { %517 = vrot.lane.b32.xlu0 %v1396_v2, %s1281_s28 }
  0x8b   : > { %527 = vrot.lane.b32.xlu1 %v1466_v61, %s1281_s28 }
  0x8c   : > { %519 = vrot.lane.b32.xlu0 %v1386_v0, %s1281_s28  ;;  %s1703_s28 = scalar_lea.vmem [#allocation2], %s991_s27  ;;  %s1186_s27 = scalar_lea.vmem %s1185_s24, 4096 }
  0x8d   : > { %s908_s16 = sshll.u32 %s1703_s28, 4  ;;  %s1741_s16 = int_to_ptr.vmem [resolvable:$true] %s908_s16 }
  0x8e   : > { %p1187_p2 = scmp.lt.s32.totalorder %s1741_s16, %s1185_s24 }
  0x8f   : > { %556 = vrot.lane.b32.xlu1 %v1491_v28, %s1282_s7 }
  0x90   : > { %548 = vrot.lane.b32.xlu0 %v1451_v52, %s1282_s7 }
  0x91   : > { %v451_v13 = vpop.permute.xlu1 %450  ;;  %v443_v14 = vpop.permute.xlu0 %442 }
  0x93   : > { %558 = vrot.lane.b32.xlu1 %v1502_v34, %s1282_s7 }
  0x94   : > { %550 = vrot.lane.b32.xlu0 %v1445_v48, %s1282_s7 }
  0x95   : > { %v430_v57 = vpop.permute.xlu1 %429 }
  0x96   : > { %v422_v15 = vpop.permute.xlu0 %421 }
  0x97   : > { %575 = vrot.lane.b32.xlu1 %v1485_v21, %s1283_s10 }
  0x98   : > { %567 = vrot.lane.b32.xlu0 %v1409_v12, %s1283_s10 }
  0x99   : > { %v432_v61 = vpop.permute.xlu1 %431 }
  0x9a   : > { %v424_v16 = vpop.permute.xlu0 %423 }
  0x9b   : > { %577 = vrot.lane.b32.xlu1 %v1496_v31, %s1283_s10 }
  0x9c   : > { %569 = vrot.lane.b32.xlu0 %v1421_v23, %s1283_s10  ;;  %s1180_s10 = scalar_lea.vmem %s1741_s16, 2048 }
  0x9d   : > { %v383_v52 = vpop.permute.xlu1 %382  ;;  %p1181_p13 = scmp.ne.s32.totalorder %s1741_s16, %s1180_s10  ;;  %p1188_p4 = scmp.lt.s32.totalorder %s1186_s27, %s1180_s10 }
  0x9e   : > { %v381_v17 = vpop.permute.xlu0 %380  ;;  %v583_v56 = vsel %vm579_vm3, %v1389_v1, %v383_v52 }
  0x9f   : > { %v581_v34 = vsel %vm579_vm3, %v1400_v4, %v381_v17  ;;  %v600_v3 = vsel %vm596_vm4, %v583_v56, %v424_v16  ;;  %p1182_p0 = pnand %p1181_p13, %p1357_p3  ;;  %p1189_p5 = por %p1188_p4, %p1187_p2 }
  0xa0   : > { %v598_v40 = vsel %vm596_vm4, %v581_v34, %v422_v15 }
  0xa1   : > { %v391_v18 = vpop.permute.xlu1 %390  ;;  %v615_v44 = vsel %vm613_vm6, %v598_v40, %v443_v14  ;;  %p1183_p1 = pneg %p1182_p0 }
  0xa2   : > { %v389_v48 = vpop.permute.xlu0 %388  ;;  %v591_v49 = vsel %vm579_vm3, %v1386_v0, %v391_v18 }
  0xa3   : > { %v589_v23 = vsel %vm579_vm3, %v1396_v2, %v389_v48  ;;  %v608_v60 = vsel %vm596_vm4, %v591_v49, %v432_v61  ;;  %p1190_p6 = pnand %p1189_p5, %p1183_p1 }
  0xa4   : > { %v606_v36 = vsel %vm596_vm4, %v589_v23, %v430_v57 }
  0xa5   : > { %v453_v19 = vpop.permute.xlu1 %452  ;;  %v623_v42 = vsel %vm613_vm6, %v606_v36, %v451_v13 }
  0xa6   : > { %v445_v20 = vpop.permute.xlu0 %444  ;;  %v625_v62 = vsel %vm613_vm6, %v608_v60, %v453_v19 }
  0xa7   : > { %v617_v1 = vsel %vm613_vm6, %v600_v3, %v445_v20 }
  0xa9   : > { %v482_v22 = vpop.permute.xlu1 %481 }
  0xaa   : > { %v474_v24 = vpop.permute.xlu0 %473  ;;  %v640_v2 = vsel %vm630_vm5, %v623_v42, %v482_v22 }
  0xab   : > { %v632_v27 = vsel %vm630_vm5, %v615_v44, %v474_v24 }
  0xad   : > { %v484_v21 = vpop.permute.xlu1 %483 }
  0xae   : > { %v476_v25 = vpop.permute.xlu0 %475  ;;  %v642_v5 = vsel %vm630_vm5, %v625_v62, %v484_v21 }
  0xaf   : > { %v634_v8 = vsel %vm630_vm5, %v617_v1, %v476_v25 }
  0xb1   : > { %v501_v26 = vpop.permute.xlu1 %500 }
  0xb2   : > { %v493_v12 = vpop.permute.xlu0 %492  ;;  %v657_v4 = vsel %vm647_vm7, %v640_v2, %v501_v26 }
  0xb3   : > { %v649_v50 = vsel %vm647_vm7, %v632_v27, %v493_v12 }
  0xb5   : > { %v503_v28 = vpop.permute.xlu1 %502 }
  0xb6   : > { %v495_v29 = vpop.permute.xlu0 %494  ;;  %v659_v6 = vsel %vm647_vm7, %v642_v5, %v503_v28 }
  0xb7   : > { %v651_v10 = vsel %vm647_vm7, %v634_v8, %v495_v29 }
  0xb9   : > { %v522_v30 = vpop.permute.xlu1 %521 }
  0xba   : > { %v514_v32 = vpop.permute.xlu0 %513  ;;  %v674_v47 = vsel %vm664_vm8, %v657_v4, %v522_v30 }
  0xbb   : > { %v666_v54 = vsel %vm664_vm8, %v649_v50, %v514_v32 }
  0xbd   : > { %v524_v31 = vpop.permute.xlu1 %523 }
  0xbe   : > { %v516_v33 = vpop.permute.xlu0 %515  ;;  %v676_v9 = vsel %vm664_vm8, %v659_v6, %v524_v31 }
  0xbf   : > { %v668_v14 = vsel %vm664_vm8, %v651_v10, %v516_v33 }
  0xc1   : > { %v553_v35 = vpop.permute.xlu1 %552 }
  0xc2   : > { %v545_v37 = vpop.permute.xlu0 %544  ;;  %v691_v51 = vsel %vm681_vm9, %v674_v47, %v553_v35 }
  0xc3   : > { %v683_v58 = vsel %vm681_vm9, %v666_v54, %v545_v37 }
  0xc5   : > { %v555_v43 = vpop.permute.xlu1 %554 }
  0xc6   : > { %v547_v45 = vpop.permute.xlu0 %546  ;;  %v693_v11 = vsel %vm681_vm9, %v676_v9, %v555_v43 }
  0xc7   : > { %v685_v15 = vsel %vm681_vm9, %v668_v14, %v547_v45 }
  0xc9   : > { %v572_v53 = vpop.permute.xlu1 %571 }
  0xca   : > { %v708_v55 = vsel %vm698_vm10, %v691_v51, %v572_v53  ;;  %v564_v59 = vpop.permute.xlu0 %563 }
  0xcb   : > { %1060 = vmatprep.mubr.msk.bf16.mxu1 %vm742_vm11, %v708_v55  ;;  %v700_v0 = vsel %vm698_vm10, %v683_v58, %v564_v59 }
  0xcc   : > { %1052 = vmatprep.mubr.msk.bf16.mxu0 %vm742_vm11, %v700_v0 }
  0xcd   : > { %v393_v63 = vpop.permute.xlu1 %392 }
  0xce   : > { %v385_v7 = vpop.permute.xlu0 %384  ;;  %v593_v40 = vsel %vm579_vm3, %v1433_v39, %v393_v63 }
  0xcf   : > { %v585_v2 = vsel %vm579_vm3, %v1440_v46, %v385_v7 }
  0xd1   : > { %v574_v13 = vpop.permute.xlu1 %573 }
  0xd2   : > { %v710_v57 = vsel %vm698_vm10, %v693_v11, %v574_v13  ;;  %v566_v61 = vpop.permute.xlu0 %565 }
  0xd3   : > { %1061 = vmatmul.mubr.msk.bf16.vlgmr.msra.gmra.mrb[0].mxu1 %vm742_vm11, %v710_v57  ;;  %v702_v16 = vsel %vm698_vm10, %v685_v15, %v566_v61  ;;  %v1016_v61 = vld [vmem:[%s1804_s2] ss:$0 sm:$0xff] }
  0xd4   : > { %1053 = vmatmul.mubr.msk.bf16.vlgmr.msra.gmra.mrb[0].mxu0 %vm742_vm11, %v702_v16 }
  0xd5   : > { %v395_v52 = vpop.permute.xlu1 %394 }
  0xd6   : > { %v387_v17 = vpop.permute.xlu0 %386  ;;  %v595_v47 = vsel %vm579_vm3, %v1511_v38, %v395_v52 }
  0xd7   : > { %v587_v54 = vsel %vm579_vm3, %v1517_v41, %v387_v17 }
  0xd9   : > { %v434_v18 = vpop.permute.xlu1 %433 }
  0xda   : > { %v426_v48 = vpop.permute.xlu0 %425  ;;  %v610_v43 = vsel %vm596_vm4, %v593_v40, %v434_v18 }
  0xdb   : > { %v602_v45 = vsel %vm596_vm4, %v585_v2, %v426_v48 }
  0xdd   : > { %v436_v19 = vpop.permute.xlu1 %435 }
  0xde   : > { %v428_v20 = vpop.permute.xlu0 %427  ;;  %v612_v51 = vsel %vm596_vm4, %v595_v47, %v436_v19 }
  0xdf   : > { %v604_v59 = vsel %vm596_vm4, %v587_v54, %v428_v20 }
  0xe1   : > { %v455_v22 = vpop.permute.xlu1 %454 }
  0xe2   : > { %v447_v24 = vpop.permute.xlu0 %446  ;;  %v627_v44 = vsel %vm613_vm6, %v610_v43, %v455_v22 }
  0xe3   : > { %v619_v49 = vsel %vm613_vm6, %v602_v45, %v447_v24 }
  0xe5   : > { %v457_v21 = vpop.permute.xlu1 %456 }
  0xe6   : > { %v449_v25 = vpop.permute.xlu0 %448  ;;  %v629_v55 = vsel %vm613_vm6, %v612_v51, %v457_v21 }
  0xe7   : > { %v621_v63 = vsel %vm613_vm6, %v604_v59, %v449_v25 }
  0xe9   : > { %v486_v26 = vpop.permute.xlu1 %485 }
  0xea   : > { %v478_v12 = vpop.permute.xlu0 %477  ;;  %v644_v27 = vsel %vm630_vm5, %v627_v44, %v486_v26 }
  0xeb   : > { %v636_v53 = vsel %vm630_vm5, %v619_v49, %v478_v12 }
  0xed   : > { %v488_v28 = vpop.permute.xlu1 %487 }
  0xee   : > { %v480_v29 = vpop.permute.xlu0 %479  ;;  %v646_v60 = vsel %vm630_vm5, %v629_v55, %v488_v28 }
  0xef   : > { %v638_v1 = vsel %vm630_vm5, %v621_v63, %v480_v29 }
  0xf1   : > { %v505_v30 = vpop.permute.xlu1 %504 }
  0xf2   : > { %v497_v32 = vpop.permute.xlu0 %496  ;;  %v661_v39 = vsel %vm647_vm7, %v644_v27, %v505_v30 }
  0xf3   : > { %v653_v56 = vsel %vm647_vm7, %v636_v53, %v497_v32 }
  0xf5   : > { %v507_v31 = vpop.permute.xlu1 %506 }
  0xf6   : > { %v499_v23 = vpop.permute.xlu0 %498  ;;  %v663_v3 = vsel %vm647_vm7, %v646_v60, %v507_v31 }
  0xf7   : > { %v655_v8 = vsel %vm647_vm7, %v638_v1, %v499_v23 }
  0xf9   : > { %v526_v33 = vpop.permute.xlu1 %525 }
  0xfa   : > { %v518_v34 = vpop.permute.xlu0 %517  ;;  %v678_v46 = vsel %vm664_vm8, %v661_v39, %v526_v33 }
  0xfb   : > { %v670_v0 = vsel %vm664_vm8, %v653_v56, %v518_v34 }
  0xfd   : > { %v528_v35 = vpop.permute.xlu1 %527 }
  0xfe   : > { %v520_v36 = vpop.permute.xlu0 %519  ;;  %v680_v6 = vsel %vm664_vm8, %v663_v3, %v528_v35 }
  0xff   : > { %v672_v11 = vsel %vm664_vm8, %v655_v8, %v520_v36 }
 0x101   : > { %v557_v37 = vpop.permute.xlu1 %556 }
 0x102   : > { %v549_v42 = vpop.permute.xlu0 %548  ;;  %v695_v38 = vsel %vm681_vm9, %v678_v46, %v557_v37 }
 0x103   : > { %v687_v41 = vsel %vm681_vm9, %v670_v0, %v549_v42 }
 0x105   : > { %v559_v4 = vpop.permute.xlu1 %558 }
 0x106   : > { %v551_v50 = vpop.permute.xlu0 %550  ;;  %v697_v9 = vsel %vm681_vm9, %v680_v6, %v559_v4 }
 0x107   : > { %v689_v14 = vsel %vm681_vm9, %v672_v11, %v551_v50 }
 0x109   : > { %v576_v58 = vpop.permute.xlu1 %575 }
 0x10a   : > { %v712_v62 = vsel %vm698_vm10, %v695_v38, %v576_v58  ;;  %v568_v5 = vpop.permute.xlu0 %567 }
 0x10b   : > { %1064 = vmatprep.mubr.msk.bf16.mxu1 %vm742_vm11, %v712_v62  ;;  %v704_v7 = vsel %vm698_vm10, %v687_v41, %v568_v5 }
 0x10c   : > { %1056 = vmatprep.mubr.msk.bf16.mxu0 %vm742_vm11, %v704_v7 }
 0x10d   : > { %v578_v10 = vpop.permute.xlu1 %577 }
 0x10e   : > { %v714_v13 = vsel %vm698_vm10, %v697_v9, %v578_v10  ;;  %v570_v57 = vpop.permute.xlu0 %569 }
 0x10f   : > { %1065 = vmatmul.mubr.msk.bf16.gmra.mrb[4].mxu1 %vm742_vm11, %v714_v13  ;;  %v706_v15 = vsel %vm698_vm10, %v689_v14, %v570_v57 }
 0x110   : > { %1057 = vmatmul.mubr.msk.bf16.gmra.mrb[4].mxu0 %vm742_vm11, %v706_v15 }
 0x1a6   : > { %v1062_v16 = vpop.f32.mrb[0].mxu1 }
 0x1a7   : > { %v838_v52 = vadd.f32 %v1062_v16, %v1016_v61  ;;  %v829_v17 = vpop.f32.mrb[1].mxu1  ;;  %v1054_v18 = vpop.f32.mrb[0].mxu0 }
 0x1a8   : > { %v830_v48 = vadd.f32 %v1016_v61, %v829_v17  ;;  %v1063_v19 = vpop.f32.mrb[2].mxu1  ;;  %v806_v20 = vadd.f32 %v1054_v18, %v1016_v61  ;;  %v797_v24 = vpop.f32.mrb[1].mxu0 }
 0x1a9   : > { %v870_v22 = vmax.f32 %v838_v52, 0.0  ;;  %v841_v21 = vadd.f32 %v1063_v19, %v1016_v61  ;;  %v832_v25 = vpop.f32.mrb[3].mxu1  ;;  %v798_v26 = vadd.f32 %v1016_v61, %v797_v24  ;;  %v1055_v28 = vpop.f32.mrb[2].mxu0 }
 0x1aa   : > { %v868_v12 = vmax.f32 %v830_v48, 0.0  ;;  %v833_v29 = vadd.f32 %v1016_v61, %v832_v25  ;;  %v862_v30 = vmax.f32 %v806_v20, 0.0  ;;  %v809_v32 = vadd.f32 %v1055_v28, %v1016_v61  ;;  %v800_v23 = vpop.f32.mrb[3].mxu0 }
 0x1ab   : > { %886 = vst.msk [vmem:[%s1703_s28 + $0x50] sm:$0xff] %vm698_vm10, %v870_v22  ;;  %v871_v31 = vmax.f32 %v841_v21, 0.0  ;;  %v860_v33 = vmax.f32 %v798_v26, 0.0  ;;  %v801_v34 = vadd.f32 %v1016_v61, %v800_v23 }
 0x1ac   : > { %884 = vst.msk [vmem:[%s1703_s28 + $0x40] sm:$0xff] %vm698_vm10, %v868_v12  ;;  %v869_v35 = vmax.f32 %v833_v29, 0.0  ;;  %878 = vst.msk [vmem:[%s1703_s28 + $0x10] sm:$0xff] %vm698_vm10, %v862_v30  ;;  %v863_v36 = vmax.f32 %v809_v32, 0.0 }
 0x1ad   : > { %887 = vst.msk [vmem:[%s1703_s28 + $0x58] sm:$0xff] %vm698_vm10, %v871_v31  ;;  %876 = vst.msk [vmem:[%s1703_s28] sm:$0xff] %vm698_vm10, %v860_v33  ;;  %v861_v37 = vmax.f32 %v801_v34, 0.0 }
 0x1ae   : > { %885 = vst.msk [vmem:[%s1703_s28 + $0x48] sm:$0xff] %vm698_vm10, %v869_v35  ;;  %879 = vst.msk [vmem:[%s1703_s28 + $0x18] sm:$0xff] %vm698_vm10, %v863_v36 }
 0x1af   : > { %877 = vst.msk [vmem:[%s1703_s28 + $0x8] sm:$0xff] %vm698_vm10, %v861_v37 }
 0x1e2   : > { %v1066_v40 = vpop.f32.mrb[4].mxu1 }
 0x1e3   : > { %v854_v42 = vadd.f32 %v1066_v40, %v1016_v61  ;;  %v845_v43 = vpop.f32.mrb[5].mxu1  ;;  %v1058_v2 = vpop.f32.mrb[4].mxu0 }
 0x1e4   : > { %v846_v44 = vadd.f32 %v1016_v61, %v845_v43  ;;  %v1067_v4 = vpop.f32.mrb[6].mxu1  ;;  %v822_v45 = vadd.f32 %v1058_v2, %v1016_v61  ;;  %v813_v47 = vpop.f32.mrb[5].mxu0 }
 0x1e5   : > { %v874_v27 = vmax.f32 %v854_v42, 0.0  ;;  %v857_v49 = vadd.f32 %v1067_v4, %v1016_v61  ;;  %v848_v39 = vpop.f32.mrb[7].mxu1  ;;  %v814_v50 = vadd.f32 %v1016_v61, %v813_v47  ;;  %v1059_v53 = vpop.f32.mrb[6].mxu0 }
 0x1e6   : > { %v872_v51 = vmax.f32 %v846_v44, 0.0  ;;  %v849_v46 = vadd.f32 %v1016_v61, %v848_v39  ;;  %v866_v54 = vmax.f32 %v822_v45, 0.0  ;;  %v825_v55 = vadd.f32 %v1059_v53, %v1016_v61  ;;  %v816_v38 = vpop.f32.mrb[7].mxu0 }
 0x1e7   : > { %890 = vst.msk [vmem:[%s1703_s28 + $0x70] sm:$0xff] %vm698_vm10, %v874_v27  ;;  %v875_v56 = vmax.f32 %v857_v49, 0.0  ;;  %v864_v58 = vmax.f32 %v814_v50, 0.0  ;;  %v817_v59 = vadd.f32 %v1016_v61, %v816_v38 }
 0x1e8   : > { %888 = vst.msk [vmem:[%s1703_s28 + $0x60] sm:$0xff] %vm698_vm10, %v872_v51  ;;  %v873_v60 = vmax.f32 %v849_v46, 0.0  ;;  %882 = vst.msk [vmem:[%s1703_s28 + $0x30] sm:$0xff] %vm698_vm10, %v866_v54  ;;  %v867_v0 = vmax.f32 %v825_v55, 0.0 }
 0x1e9   : > { %891 = vst.msk [vmem:[%s1703_s28 + $0x78] sm:$0xff] %vm698_vm10, %v875_v56  ;;  %880 = vst.msk [vmem:[%s1703_s28 + $0x20] sm:$0xff] %vm698_vm10, %v864_v58  ;;  %v865_v62 = vmax.f32 %v817_v59, 0.0 }
 0x1ea   : > { %889 = vst.msk [vmem:[%s1703_s28 + $0x68] sm:$0xff] %vm698_vm10, %v873_v60  ;;  %883 = vst.msk [vmem:[%s1703_s28 + $0x38] sm:$0xff] %vm698_vm10, %v867_v0 }
 0x1eb   : > { %881 = vst.msk [vmem:[%s1703_s28 + $0x28] sm:$0xff] %vm698_vm10, %v865_v62 }
 0x1ec   : > { %1193 = shalt.err (!%p1190_p6)
}
 0x1ed   : > { %s1194_s11 = scalar_lea.hbm %s1735_s8, 2048  ;;  %s1198_s4 = scalar_lea.hbm %s1805_s3, 8192 }
 0x1ee   : > { %p1195_p7 = scmp.ne.s32.totalorder %s1735_s8, %s1194_s11  ;;  %p1199_p11 = scmp.lt.u32.totalorder %s1735_s8, %s1805_s3 }
 0x1ef   : > { %p1200_p12 = scmp.lt.u32.totalorder %s1198_s4, %s1194_s11  ;;  %p1202_p0 = scmp.lt.u32.totalorder %s1194_s11, %s1735_s8 }
 0x1f0   : > { %p1196_p9 = pnand %p1195_p7, %p1357_p3 }
 0x1f1   : > { %p1201_p13 = por %p1200_p12, %p1199_p11 }
 0x1f2   : > { %p1197_p10 = pneg %p1196_p9 }
 0x1f3   : > { %p1203_p1 = por %p1202_p0, %p1201_p13 }
 0x1f5   : > { %p1204_p2 = pnand %p1203_p1, %p1197_p10 }
 0x1f7   : > { %1207 = shalt.err (!%p1204_p2)
}
 0x1f8   : > { %s1285_s6 = smov 128  }
 0x1f9   : > { %1077 = dma.vmem_to_hbm [thread:$0]  (%p1357_p3), %s1741_s16, 2048, %s1735_s8, %s1749_s9, %s1285_s6, %s1285_s6, %s1277_s20  }
 0x1fa PF: > { %p1083_p4 = scmp.ge.s32.totalorder %s1274_s19, 2  ;;  %s923_s7 = sand.u32 1, %s1246_s12  }
 0x1fb   : > { %s924_s10 = scalar_lea.sflag [#allocation3], %s923_s7 }
 0x1fc   : > { %p1080_p5 = pnand %p1083_p4, %p1366_p8 }
 0x1fe   : > { %1241 = dma.done.wait (!%p1080_p5), %s924_s10, 2048  }
 0x1ff   : > { %1243 = vsyncadd (!%p1080_p5), %s924_s10, 4294965248  ;;  %s16_s19 = sadd.s32 1, %s1274_s19   ;;  %s1808_s12 = smov %s1250_s13 }
 0x200   : > { %p13_p6 = scmp.ge.s32.totalorder %s16_s19, 6   ;;  %s1809_s13 = smov %s1254_s14 }
 0x201   : > { %s1810_s14 = smov %s1375_s30  ;;  %s1811_s15 = smov %s1266_s17 }
 0x202   : > { %s1812_s16 = smov %s1270_s18  ;;  %s1813_s17 = smov %s1816_s22 }
 0x203   : > { %s1814_s18 = smov %s1820_s23  ;;  %15 = sbr.rel (!%p13_p6) target bundleno = 5 (0x5), region = 68 }
 0x20a   :  { %929 = vsyncpa [#allocation3], 1 }
 0x20b   :  { %931 = vsyncpa [#allocation3 + $0x1], 1 }

</bundles_post_ra>
